<compile_context>
chip_gen: v7x
topology: tpu7x:2x2x1
jax: 0.10.0
libtpu: 0.0.40
codegen_flags: <defaults>
</compile_context>

<pallas_src>
import functools

import jax
import jax.numpy as jnp
from jax.experimental import pallas as pl
from jax.experimental.pallas import tpu as pltpu

FEAT_DIM = 2048    # matches nn.Linear(2048, 1) in BaseModel
F_CHUNK = 512      # feature dim processed in lane chunks (multiple of 256)
OUT_PAD = 128      # lane-dense output width (sliced to 1 in the wrapper)
MAX_P_TILE = 512   # cap: (p_tile, F_CHUNK) f32 epilogue ~1 MiB (v5e-friendly)


def _round_up(x, m):
    return ((x + m - 1) // m) * m


def base_model_kernel(patches_ref, w_embed_ref, b_embed_ref, w_head_ref,
                      b_head_ref, out_ref, acc_ref, *,
                      n_patches, p_tile, needs_mask):
    """Grid = (B, P_pad // p_tile); trailing grid axis is the patch reduction.

    patches_ref: (1, p_tile, K)   bf16  un-padded patch pixels
    w_embed_ref: (K, F)           bf16  patch-embed "conv" weight (resident)
    b_embed_ref: (1, F)           f32
    w_head_ref : (1, F)           f32   last_linear weight (row layout)
    b_head_ref : (1,)             f32   SMEM scalar
    out_ref    : (1, 1, OUT_PAD)  f32   sigmoid(logit), lane-dense
    acc_ref    : (1, OUT_PAD)     f32   VMEM scratch: head-dot partial sum
                                        (same scalar broadcast across lanes)
    """
    p = pl.program_id(1)

    @pl.when(p == 0)
    def _init():
        acc_ref[...] = jnp.zeros_like(acc_ref)

    x = patches_ref[0]                              # (p_tile, K) bf16
    f_dim = w_embed_ref.shape[1]

    if needs_mask:
        # Zero-padded patch rows are not neutral through bias+ReLU; mask them.
        row = jax.lax.broadcasted_iota(jnp.int32, (p_tile, 1), 0) + p * p_tile
        mask = (row < n_patches).astype(jnp.float32)        # (p_tile, 1)
    else:
        mask = None

    # Fused matmul + bias + ReLU + head-weight + full reduction, one F-chunk at
    # a time, so the full (p_tile, 2048) feature map is never live at once.
    partial = jnp.zeros((1, 1), jnp.float32)
    for c in range(f_dim // F_CHUNK):               # static unroll (4 chunks)
        off = c * F_CHUNK
        feat = jnp.dot(x, w_embed_ref[:, off:off + F_CHUNK],
                       preferred_element_type=jnp.float32)  # (p_tile, F_CHUNK)
        feat = jnp.maximum(feat + b_embed_ref[:, off:off + F_CHUNK], 0.0)
        weighted = feat * w_head_ref[:, off:off + F_CHUNK]  # head dot, folded
        if mask is not None:
            weighted = weighted * mask
        col = jnp.sum(weighted, axis=0, keepdims=True)      # (1, F_CHUNK)
        partial = partial + jnp.sum(col, axis=1, keepdims=True)   # (1, 1)

    acc_ref[...] = acc_ref[...] + partial           # (1,1) broadcast over lanes

    @pl.when(p == pl.num_programs(1) - 1)
    def _finalize():
        logit = acc_ref[...] * (1.0 / n_patches) + b_head_ref[0]
        logit = jnp.clip(logit, -30.0, 30.0)        # overflow-safe sigmoid
        out_ref[0] = 1.0 / (1.0 + jnp.exp(-logit))  # (1, OUT_PAD), EUP exp


def base_model_forward(x_nchw, params, *, patch=4):
    """x_nchw: (B, C, H, W) float32. Returns (B, 1) probabilities."""
    B, C, H, W = x_nchw.shape
    ph = pw = patch
    assert H % ph == 0 and W % pw == 0
    P = (H // ph) * (W // pw)
    K = C * ph * pw

    # Patchify NCHW -> (B, P, K); channel-major inside a patch (matches w_embed
    # rows).  Cast once to bf16, NO contraction-dim padding -> the kernel reads
    # 48 lanes, not 128, per patch (no inflated HBM round trip).
    # TODO(synk): accepting NHWC / pre-patchified input would make this
    # reshape-only (no 6-D transpose before the kernel).
    patches = x_nchw.reshape(B, C, H // ph, ph, W // pw, pw)
    patches = patches.transpose(0, 2, 4, 1, 3, 5).reshape(B, P, K)
    patches = patches.astype(jnp.bfloat16)

    # Patch tile: >=256 fills v6e/v7x 256-wide MXU rows; <=512 keeps the
    # (p_tile, F_CHUNK) f32 epilogue at ~1 MiB for v5e's single store slot.
    if P <= MAX_P_TILE:
        p_tile = max(16, _round_up(P, 16))
    else:
        p_tile = MAX_P_TILE
        for cand in (512, 256):
            if P % cand == 0:
                p_tile = cand
                break
    P_pad = _round_up(P, p_tile)
    needs_mask = P_pad != P
    if needs_mask:
        patches = jnp.pad(patches, ((0, 0), (0, P_pad - P), (0, 0)))

    w_embed, b_embed, w_head, b_head = params
    w_embed = w_embed.astype(jnp.bfloat16)                 # (K, F)
    b_embed = b_embed.reshape(1, -1).astype(jnp.float32)   # (1, F)
    w_head = w_head.reshape(1, -1).astype(jnp.float32)     # (1, F)
    b_head = b_head.reshape(-1).astype(jnp.float32)        # (1,)  -> SMEM

    F = w_embed.shape[1]
    assert F % F_CHUNK == 0 and w_embed.shape[0] == K

    grid = (B, P_pad // p_tile)

    flops = 2 * B * P_pad * K * F + 4 * B * P_pad * F + 2 * B * F
    bytes_accessed = (patches.size * 2 + w_embed.size * 2
                      + (b_embed.size + w_head.size + b_head.size) * 4
                      + B * OUT_PAD * 4)

    kernel = functools.partial(base_model_kernel, n_patches=P, p_tile=p_tile,
                               needs_mask=needs_mask)
    out = pl.pallas_call(
        kernel,
        out_shape=jax.ShapeDtypeStruct((B, 1, OUT_PAD), jnp.float32),
        grid_spec=pltpu.PrefetchScalarGridSpec(
            num_scalar_prefetch=0,
            grid=grid,
            in_specs=[
                pl.BlockSpec((1, p_tile, K), lambda b, p: (b, p, 0)),  # patches
                # TODO(synk): w_embed is grid-invariant; pl.Buffered(1) would
                # drop its second VMEM buffer (~192 KiB) -- skipped, tiny win.
                pl.BlockSpec((K, F), lambda b, p: (0, 0)),             # w_embed
                pl.BlockSpec((1, F), lambda b, p: (0, 0)),             # b_embed
                pl.BlockSpec((1, F), lambda b, p: (0, 0)),             # w_head
                pl.BlockSpec(memory_space=pltpu.MemorySpace.SMEM),     # b_head
            ],
            out_specs=pl.BlockSpec((1, 1, OUT_PAD), lambda b, p: (b, 0, 0)),
            scratch_shapes=[pltpu.VMEM((1, OUT_PAD), jnp.float32)],
        ),
        compiler_params=pltpu.CompilerParams(
            dimension_semantics=("parallel", "arbitrary"),
            vmem_limit_bytes=32 << 20,
        ),
        cost_estimate=pl.CostEstimate(
            flops=flops, transcendentals=B * OUT_PAD,
            bytes_accessed=bytes_accessed),
    )(patches, w_embed, b_embed, w_head, b_head)
    return out[:, 0, :1]


def make_params(key, *, in_ch=3, patch=4, feat_dim=FEAT_DIM):
    k = in_ch * patch * patch
    k1, k2, k3, k4 = jax.random.split(key, 4)
    w_embed = jax.random.normal(k1, (k, feat_dim), jnp.float32) * (1.0 / jnp.sqrt(k))
    b_embed = jax.random.normal(k2, (1, feat_dim), jnp.float32) * 0.01
    w_head = jax.random.normal(k3, (1, feat_dim), jnp.float32) * (1.0 / jnp.sqrt(feat_dim))
    b_head = jax.random.normal(k4, (1, 1), jnp.float32) * 0.01
    return (w_embed, b_embed, w_head, b_head)


def reference_forward(x_nchw, params, *, patch=4):
    """Pure-JAX reference (mirrors the kernel's bf16 MXU inputs / f32 accum)."""
    B, C, H, W = x_nchw.shape
    P = (H // patch) * (W // patch)
    K = C * patch * patch
    patches = x_nchw.reshape(B, C, H // patch, patch, W // patch, patch)
    patches = patches.transpose(0, 2, 4, 1, 3, 5).reshape(B, P, K)
    w_embed, b_embed, w_head, b_head = params
    feat = jnp.dot(patches.astype(jnp.bfloat16), w_embed.astype(jnp.bfloat16),
                   preferred_element_type=jnp.float32)
    feat = jnp.maximum(feat + b_embed, 0.0)     # (B, P, F)
    pooled = feat.mean(axis=1)                  # (B, F)
    logit = pooled @ w_head.T + b_head          # (B, 1)
    return jax.nn.sigmoid(logit)


if __name__ == "__main__":
    key = jax.random.PRNGKey(0)
    kx, kp = jax.random.split(key)
    # Small, module-consistent shapes: NCHW image batch (3-channel like xception).
    x = jax.random.normal(kx, (2, 3, 16, 16), jnp.float32)
    params = make_params(kp)

    out = base_model_forward(x, params)
    out = jax.block_until_ready(out)

    ref = reference_forward(x, params)
    assert out.shape == (2, 1)
    assert bool(jnp.all(jnp.isfinite(out)))
    assert jnp.allclose(out, ref, atol=2e-3, rtol=2e-3), (out, ref)
    print("KERNEL_OK")
</pallas_src>

<mosaic_0001>
module attributes {stable_mosaic.version = 11 : i64} {
  func.func @base_model_kernel(%arg0: i32, %arg1: i32, %arg2: memref<1x16x48xbf16, #tpu.memory_space<vmem>>, %arg3: memref<48x2048xbf16, #tpu.memory_space<vmem>>, %arg4: memref<1x2048xf32, #tpu.memory_space<vmem>>, %arg5: memref<1x2048xf32, #tpu.memory_space<vmem>>, %arg6: memref<1xf32, #tpu.memory_space<smem>>, %arg7: memref<1x1x128xf32, #tpu.memory_space<vmem>>, %arg8: memref<1x128xf32, #tpu.memory_space<vmem>>) attributes {dimension_semantics = [#tpu.dimension_semantics<parallel>, #tpu.dimension_semantics<arbitrary>], iteration_bounds = array<i64: 2, 1>, scalar_prefetch = 0 : i64, scratch_operands = 1 : i64, tpu.core_type = #tpu.core_type<tc>, window_params = [{transform_indices = @transform_0, window_bounds = array<i64: 1, 16, 48>}, {pipeline_mode = #tpu.pipeline_mode<synchronous>, transform_indices = @transform_1, window_bounds = array<i64: 48, 2048>}, {pipeline_mode = #tpu.pipeline_mode<synchronous>, transform_indices = @transform_2, window_bounds = array<i64: 1, 2048>}, {pipeline_mode = #tpu.pipeline_mode<synchronous>, transform_indices = @transform_3, window_bounds = array<i64: 1, 2048>}, {transform_indices = @transform_4, window_bounds = array<i64: 1>}, {transform_indices = @transform_5, window_bounds = array<i64: 1, 1, 128>}]} {
    %c0_i32 = arith.constant 0 : i32
    %0 = arith.cmpi eq, %arg1, %c0_i32 : i32
    %1 = arith.extui %0 : i1 to i32
    %c0_i32_0 = arith.constant 0 : i32
    %2 = arith.cmpi ne, %1, %c0_i32_0 : i32
    scf.if %2 {
      %cst_46 = arith.constant 0.000000e+00 : f32
      %73 = vector.broadcast %cst_46 : f32 to vector<1x128xf32>
      %c0_47 = arith.constant 0 : index
      %c0_48 = arith.constant 0 : index
      %74 = vector.load %arg8[%c0_47, %c0_48] : memref<1x128xf32, #tpu.memory_space<vmem>>, vector<1x128xf32>
      tpu.vector_store %arg8[%c0_47, %c0_48], %73 {strides = array<i32>} : memref<1x128xf32, #tpu.memory_space<vmem>>, vector<1x128xf32>,
    } else {
    }
    %c0 = arith.constant 0 : index
    %c0_1 = arith.constant 0 : index
    %c0_2 = arith.constant 0 : index
    %3 = vector.load %arg2[%c0, %c0_1, %c0_2] : memref<1x16x48xbf16, #tpu.memory_space<vmem>>, vector<1x16x48xbf16>
    %4 = vector.shape_cast %3 : vector<1x16x48xbf16> to vector<16x48xbf16>
    %cst = arith.constant 0.000000e+00 : f32
    %5 = vector.broadcast %cst : f32 to vector<1x1xf32>
    %c0_3 = arith.constant 0 : index
    %c0_4 = arith.constant 0 : index
    %6 = vector.load %arg3[%c0_3, %c0_4] : memref<48x2048xbf16, #tpu.memory_space<vmem>>, vector<48x512xbf16>
    %cst_5 = arith.constant dense<0.000000e+00> : vector<16x512xf32>
    %7 = tpu.matmul %4, %6, %cst_5 {dimension_numbers = #tpu.dot_dimension_numbers<[1], [0], [0], [1], [0, 0, 1, 1], [], []>} : vector<16x48xbf16>, vector<48x512xbf16>, vector<16x512xf32> -> vector<16x512xf32>
    %c0_6 = arith.constant 0 : index
    %c0_7 = arith.constant 0 : index
    %8 = vector.load %arg4[%c0_6, %c0_7] : memref<1x2048xf32, #tpu.memory_space<vmem>>, vector<1x512xf32>
    %9 = vector.broadcast %8 : vector<1x512xf32> to vector<16x512xf32>
    %10 = arith.addf %7, %9 : vector<16x512xf32>
    %cst_8 = arith.constant 0.000000e+00 : f32
    %11 = vector.broadcast %cst_8 : f32 to vector<16x512xf32>
    %12 = arith.maximumf %10, %11 : vector<16x512xf32>
    %c0_9 = arith.constant 0 : index
    %c0_10 = arith.constant 0 : index
    %13 = vector.load %arg5[%c0_9, %c0_10] : memref<1x2048xf32, #tpu.memory_space<vmem>>, vector<1x512xf32>
    %14 = vector.broadcast %13 : vector<1x512xf32> to vector<16x512xf32>
    %15 = arith.mulf %12, %14 : vector<16x512xf32>
    %cst_11 = arith.constant dense<0.000000e+00> : vector<512xf32>
    %16 = vector.multi_reduction <add>, %15, %cst_11 [0] : vector<16x512xf32> to vector<512xf32>
    %17 = vector.shape_cast %16 : vector<512xf32> to vector<1x512xf32>
    %cst_12 = arith.constant dense<0.000000e+00> : vector<1xf32>
    %18 = vector.multi_reduction <add>, %17, %cst_12 [1] : vector<1x512xf32> to vector<1xf32>
    %19 = vector.shape_cast %18 : vector<1xf32> to vector<1x1xf32>
    %20 = arith.addf %5, %19 : vector<1x1xf32>
    %c0_13 = arith.constant 0 : index
    %c512 = arith.constant 512 : index
    %21 = vector.load %arg3[%c0_13, %c512] : memref<48x2048xbf16, #tpu.memory_space<vmem>>, vector<48x512xbf16>
    %cst_14 = arith.constant dense<0.000000e+00> : vector<16x512xf32>
    %22 = tpu.matmul %4, %21, %cst_14 {dimension_numbers = #tpu.dot_dimension_numbers<[1], [0], [0], [1], [0, 0, 1, 1], [], []>} : vector<16x48xbf16>, vector<48x512xbf16>, vector<16x512xf32> -> vector<16x512xf32>
    %c0_15 = arith.constant 0 : index
    %c512_16 = arith.constant 512 : index
    %23 = vector.load %arg4[%c0_15, %c512_16] : memref<1x2048xf32, #tpu.memory_space<vmem>>, vector<1x512xf32>
    %24 = vector.broadcast %23 : vector<1x512xf32> to vector<16x512xf32>
    %25 = arith.addf %22, %24 : vector<16x512xf32>
    %cst_17 = arith.constant 0.000000e+00 : f32
    %26 = vector.broadcast %cst_17 : f32 to vector<16x512xf32>
    %27 = arith.maximumf %25, %26 : vector<16x512xf32>
    %c0_18 = arith.constant 0 : index
    %c512_19 = arith.constant 512 : index
    %28 = vector.load %arg5[%c0_18, %c512_19] : memref<1x2048xf32, #tpu.memory_space<vmem>>, vector<1x512xf32>
    %29 = vector.broadcast %28 : vector<1x512xf32> to vector<16x512xf32>
    %30 = arith.mulf %27, %29 : vector<16x512xf32>
    %cst_20 = arith.constant dense<0.000000e+00> : vector<512xf32>
    %31 = vector.multi_reduction <add>, %30, %cst_20 [0] : vector<16x512xf32> to vector<512xf32>
    %32 = vector.shape_cast %31 : vector<512xf32> to vector<1x512xf32>
    %cst_21 = arith.constant dense<0.000000e+00> : vector<1xf32>
    %33 = vector.multi_reduction <add>, %32, %cst_21 [1] : vector<1x512xf32> to vector<1xf32>
    %34 = vector.shape_cast %33 : vector<1xf32> to vector<1x1xf32>
    %35 = arith.addf %20, %34 : vector<1x1xf32>
    %c0_22 = arith.constant 0 : index
    %c1024 = arith.constant 1024 : index
    %36 = vector.load %arg3[%c0_22, %c1024] : memref<48x2048xbf16, #tpu.memory_space<vmem>>, vector<48x512xbf16>
    %cst_23 = arith.constant dense<0.000000e+00> : vector<16x512xf32>
    %37 = tpu.matmul %4, %36, %cst_23 {dimension_numbers = #tpu.dot_dimension_numbers<[1], [0], [0], [1], [0, 0, 1, 1], [], []>} : vector<16x48xbf16>, vector<48x512xbf16>, vector<16x512xf32> -> vector<16x512xf32>
    %c0_24 = arith.constant 0 : index
    %c1024_25 = arith.constant 1024 : index
    %38 = vector.load %arg4[%c0_24, %c1024_25] : memref<1x2048xf32, #tpu.memory_space<vmem>>, vector<1x512xf32>
    %39 = vector.broadcast %38 : vector<1x512xf32> to vector<16x512xf32>
    %40 = arith.addf %37, %39 : vector<16x512xf32>
    %cst_26 = arith.constant 0.000000e+00 : f32
    %41 = vector.broadcast %cst_26 : f32 to vector<16x512xf32>
    %42 = arith.maximumf %40, %41 : vector<16x512xf32>
    %c0_27 = arith.constant 0 : index
    %c1024_28 = arith.constant 1024 : index
    %43 = vector.load %arg5[%c0_27, %c1024_28] : memref<1x2048xf32, #tpu.memory_space<vmem>>, vector<1x512xf32>
    %44 = vector.broadcast %43 : vector<1x512xf32> to vector<16x512xf32>
    %45 = arith.mulf %42, %44 : vector<16x512xf32>
    %cst_29 = arith.constant dense<0.000000e+00> : vector<512xf32>
    %46 = vector.multi_reduction <add>, %45, %cst_29 [0] : vector<16x512xf32> to vector<512xf32>
    %47 = vector.shape_cast %46 : vector<512xf32> to vector<1x512xf32>
    %cst_30 = arith.constant dense<0.000000e+00> : vector<1xf32>
    %48 = vector.multi_reduction <add>, %47, %cst_30 [1] : vector<1x512xf32> to vector<1xf32>
    %49 = vector.shape_cast %48 : vector<1xf32> to vector<1x1xf32>
    %50 = arith.addf %35, %49 : vector<1x1xf32>
    %c0_31 = arith.constant 0 : index
    %c1536 = arith.constant 1536 : index
    %51 = vector.load %arg3[%c0_31, %c1536] : memref<48x2048xbf16, #tpu.memory_space<vmem>>, vector<48x512xbf16>
    %cst_32 = arith.constant dense<0.000000e+00> : vector<16x512xf32>
    %52 = tpu.matmul %4, %51, %cst_32 {dimension_numbers = #tpu.dot_dimension_numbers<[1], [0], [0], [1], [0, 0, 1, 1], [], []>} : vector<16x48xbf16>, vector<48x512xbf16>, vector<16x512xf32> -> vector<16x512xf32>
    %c0_33 = arith.constant 0 : index
    %c1536_34 = arith.constant 1536 : index
    %53 = vector.load %arg4[%c0_33, %c1536_34] : memref<1x2048xf32, #tpu.memory_space<vmem>>, vector<1x512xf32>
    %54 = vector.broadcast %53 : vector<1x512xf32> to vector<16x512xf32>
    %55 = arith.addf %52, %54 : vector<16x512xf32>
    %cst_35 = arith.constant 0.000000e+00 : f32
    %56 = vector.broadcast %cst_35 : f32 to vector<16x512xf32>
    %57 = arith.maximumf %55, %56 : vector<16x512xf32>
    %c0_36 = arith.constant 0 : index
    %c1536_37 = arith.constant 1536 : index
    %58 = vector.load %arg5[%c0_36, %c1536_37] : memref<1x2048xf32, #tpu.memory_space<vmem>>, vector<1x512xf32>
    %59 = vector.broadcast %58 : vector<1x512xf32> to vector<16x512xf32>
    %60 = arith.mulf %57, %59 : vector<16x512xf32>
    %cst_38 = arith.constant dense<0.000000e+00> : vector<512xf32>
    %61 = vector.multi_reduction <add>, %60, %cst_38 [0] : vector<16x512xf32> to vector<512xf32>
    %62 = vector.shape_cast %61 : vector<512xf32> to vector<1x512xf32>
    %cst_39 = arith.constant dense<0.000000e+00> : vector<1xf32>
    %63 = vector.multi_reduction <add>, %62, %cst_39 [1] : vector<1x512xf32> to vector<1xf32>
    %64 = vector.shape_cast %63 : vector<1xf32> to vector<1x1xf32>
    %65 = arith.addf %50, %64 : vector<1x1xf32>
    %c0_40 = arith.constant 0 : index
    %c0_41 = arith.constant 0 : index
    %66 = vector.load %arg8[%c0_40, %c0_41] : memref<1x128xf32, #tpu.memory_space<vmem>>, vector<1x128xf32>
    %67 = vector.broadcast %65 : vector<1x1xf32> to vector<1x128xf32>
    %68 = arith.addf %66, %67 : vector<1x128xf32>
    %c0_42 = arith.constant 0 : index
    %c0_43 = arith.constant 0 : index
    %69 = vector.load %arg8[%c0_42, %c0_43] : memref<1x128xf32, #tpu.memory_space<vmem>>, vector<1x128xf32>
    tpu.vector_store %arg8[%c0_42, %c0_43], %68 {strides = array<i32>} : memref<1x128xf32, #tpu.memory_space<vmem>>, vector<1x128xf32>,
    %c0_i32_44 = arith.constant 0 : i32
    %70 = arith.cmpi eq, %arg1, %c0_i32_44 : i32
    %71 = arith.extui %70 : i1 to i32
    %c0_i32_45 = arith.constant 0 : i32
    %72 = arith.cmpi ne, %71, %c0_i32_45 : i32
    scf.if %72 {
      %c0_46 = arith.constant 0 : index
      %c0_47 = arith.constant 0 : index
      %73 = vector.load %arg8[%c0_46, %c0_47] : memref<1x128xf32, #tpu.memory_space<vmem>>, vector<1x128xf32>
      %cst_48 = arith.constant 6.250000e-02 : f32
      %74 = vector.broadcast %cst_48 : f32 to vector<1x128xf32>
      %75 = arith.mulf %73, %74 : vector<1x128xf32>
      %c0_49 = arith.constant 0 : index
      %76 = memref.load %arg6[%c0_49] : memref<1xf32, #tpu.memory_space<smem>>
      %77 = vector.broadcast %76 : f32 to vector<1x128xf32>
      %78 = arith.addf %75, %77 : vector<1x128xf32>
      %cst_50 = arith.constant -3.000000e+01 : f32
      %cst_51 = arith.constant 3.000000e+01 : f32
      %79 = vector.broadcast %cst_50 : f32 to vector<1x128xf32>
      %80 = arith.maximumf %79, %78 : vector<1x128xf32>
      %81 = vector.broadcast %cst_51 : f32 to vector<1x128xf32>
      %82 = arith.minimumf %81, %80 : vector<1x128xf32>
      %cst_52 = arith.constant 0.000000e+00 : f32
      %83 = vector.broadcast %cst_52 : f32 to vector<1x128xf32>
      %84 = arith.subf %83, %82 : vector<1x128xf32>
      %85 = math.exp %84 : vector<1x128xf32>
      %cst_53 = arith.constant 1.000000e+00 : f32
      %86 = vector.broadcast %cst_53 : f32 to vector<1x128xf32>
      %87 = arith.addf %86, %85 : vector<1x128xf32>
      %cst_54 = arith.constant 1.000000e+00 : f32
      %88 = vector.broadcast %cst_54 : f32 to vector<1x128xf32>
      %89 = arith.divf %88, %87 : vector<1x128xf32>
      %c0_55 = arith.constant 0 : index
      %c0_56 = arith.constant 0 : index
      %c0_57 = arith.constant 0 : index
      %90 = vector.load %arg7[%c0_55, %c0_56, %c0_57] : memref<1x1x128xf32, #tpu.memory_space<vmem>>, vector<1x1x128xf32>
      %91 = vector.shape_cast %90 : vector<1x1x128xf32> to vector<1x128xf32>
      %92 = vector.shape_cast %89 : vector<1x128xf32> to vector<1x1x128xf32>
      tpu.vector_store %arg7[%c0_55, %c0_56, %c0_57], %92 {strides = array<i32>} : memref<1x1x128xf32, #tpu.memory_space<vmem>>, vector<1x1x128xf32>,
    } else {
    }
    return
  }
  func.func @transform_0(%arg0: i32, %arg1: i32) -> (i32, i32, i32) {
    %c0_i32 = arith.constant 0 : i32
    %c0_i32_0 = arith.constant 0 : i32
    return %arg0, %arg1, %c0_i32 : i32, i32, i32
  }
  func.func @transform_1(%arg0: i32, %arg1: i32) -> (i32, i32) {
    %c0_i32 = arith.constant 0 : i32
    %c0_i32_0 = arith.constant 0 : i32
    %c0_i32_1 = arith.constant 0 : i32
    return %c0_i32, %c0_i32_0 : i32, i32
  }
  func.func @transform_2(%arg0: i32, %arg1: i32) -> (i32, i32) {
    %c0_i32 = arith.constant 0 : i32
    %c0_i32_0 = arith.constant 0 : i32
    %c0_i32_1 = arith.constant 0 : i32
    return %c0_i32, %c0_i32_0 : i32, i32
  }
  func.func @transform_3(%arg0: i32, %arg1: i32) -> (i32, i32) {
    %c0_i32 = arith.constant 0 : i32
    %c0_i32_0 = arith.constant 0 : i32
    %c0_i32_1 = arith.constant 0 : i32
    return %c0_i32, %c0_i32_0 : i32, i32
  }
  func.func @transform_4(%arg0: i32, %arg1: i32) -> i32 {
    %c0_i32 = arith.constant 0 : i32
    %c0_i32_0 = arith.constant 0 : i32
    return %c0_i32 : i32
  }
  func.func @transform_5(%arg0: i32, %arg1: i32) -> (i32, i32, i32) {
    %c0_i32 = arith.constant 0 : i32
    %c0_i32_0 = arith.constant 0 : i32
    %c0_i32_1 = arith.constant 0 : i32
    return %arg0, %c0_i32, %c0_i32_0 : i32, i32, i32
  }
}

</mosaic_0001>

<bundles_post_ra>
// kernel: tpu_custom_call.1
= control target key start
LH: loop header
LB: loop body
LE: loop exit
PB: predicated region body
PF: predicated region fallthrough
CT: control target
= control target key end

     0   :  { %s2348_s0 = inlined_call_operand.hbm [shape: bf16[2,16,48], index: 0, kind: input, shape index: {}]   ;;  %s2349_s1 = inlined_call_operand.hbm [shape: bf16[48,2048], index: 1, kind: input, shape index: {}]   ;;  %s2350_s2 = inlined_call_operand.hbm [shape: f32[1,2048], index: 2, kind: input, shape index: {}]   ;;  %s2351_s3 = inlined_call_operand.hbm [shape: f32[1,2048], index: 3, kind: input, shape index: {}]   ;;  %s2352_s4 = inlined_call_operand.<no memory space> [shape: f32[1], index: 4, kind: input, shape index: {}]   ;;  %s2353_s5 = inlined_call_operand.hbm [shape: f32[2,1,128], index: 5, kind: output, shape index: {}]  }
   0x1   :  { %10 = sst [smem:[#allocation3]] %s2352_s4 }
   0x2   :  { %11 = vsyncpa [#allocation5], 0 }
   0x3   :  { %13 = vsyncpa [#allocation5 + $0x1], 0 }
   0x4   :  { %14 = vsyncpa [#allocation8], 0 }
   0x5   :  { %15 = vsyncpa [#allocation11], 0 }
   0x6   :  { %16 = vsyncpa [#allocation6], 0 }
   0x7   :  { %18 = vsyncpa [#allocation6 + $0x1], 0  ;;  %s1893_s20 = smov 0   ;;  %s1895_s21 = smov 0  }
   0x8   :  { %s1897_s22 = smov 0   ;;  %s1899_s23 = smov 0  }
   0x9   :  { %s1901_s24 = smov 0   ;;  %s1903_s25 = smov 0  }
   0xa LB: > { %s1464_s4 = sadd.s32 4294967295, %s1848_s25   ;;  %s1465_s26 = sadd.s32 4294967294, %s1848_s25   ;;  %s1848_s25 = sphi %s1903_s25, %s24_s25   ;;  %s1844_s24 = sphi %s1901_s24, %s2380_s24   ;;  %s1840_s23 = sphi %s1899_s23, %s2379_s23   ;;  %s1836_s22 = sphi %s1897_s22, %s2378_s22   ;;  %s1832_s21 = sphi %s1895_s21, %s2377_s21   ;;  %s1828_s20 = sphi %s1893_s20, %s2376_s20  }
   0xb   : > { %p58_p0 = scmp.ne.s32.totalorder %s1832_s21, %s1828_s20  ;;  %p1927_p1 = scmp.eq.s32.totalorder %s1464_s4, 0 }
   0xc   : > { %p1931_p2 = scmp.eq.s32.totalorder %s1464_s4, 1  ;;  %p172_p3 = scmp.eq.s32.totalorder %s1465_s26, 1 }
   0xd   : > { %s2359_s27 = scalar_select %p1927_p1, 1, 0 }
   0xe   : > { %s2360_s28 = scalar_select %p1931_p2, 1, 0 }
   0xf   : > { %p1937_p4 = por %p1927_p1, %p58_p0  ;;  %p1466_p5 = scmp.ge.s32.totalorder %s1848_s25, 1 }
  0x10   : > { %p1942_p6 = por %p172_p3, %p58_p0  ;;  %p179_p7 = scmp.lt.s32.totalorder %s1848_s25, 3 }
  0x11   : > { %s2361_s29 = scalar_select %p1937_p4, 1, 0 }
  0x12   : > { %s2362_s30 = scalar_select %p1942_p6, 1, 0 }
  0x13   : > { %p1947_p8 = pnand %p1466_p5, %p179_p7  ;;  %s1850_s7 = smov [#allocation7]  }
  0x14   : > { %2363 = sst [smem:[#allocation17_spill]] %s2362_s30  ;;  %s191_s8 = sshll.u32 %s1850_s7, 4  ;;  %s1951_s8 = int_to_ptr.vmem [resolvable:$true] %s191_s8 }
  0x15   : > { %s2364_s6 = scalar_select %p1947_p8, 1, 0 }
  0x16   : > { %p1557_p9 = pneg %p1947_p8  ;;  %s1851_s10 = smov [#allocation9]  }
  0x17   : > { %s205_s11 = sshll.u32 %s1851_s10, 4  ;;  %s1852_s12 = smov [#allocation10]   ;;  %s1962_s11 = int_to_ptr.vmem [resolvable:$true] %s205_s11 }
  0x18   : > { %p1958_p11 = pnand %p1557_p9, %p1927_p1  ;;  %s1964_s13 = sshll.u32 %s1852_s12, 4  ;;  %s217_s13 = int_to_ptr.vmem [resolvable:$true] %s1964_s13 }
  0x19   : > { %s1644_s16 = scalar_lea.hbm %s2349_s1, 6144 }
  0x1a   : > { %p1645_p12 = scmp.ne.s32.totalorder %s2349_s1, %s1644_s16  ;;  %p1974_p13 = pneg %p1958_p11 }
  0x1b   : > { %p1651_p5 = scmp.lt.u32.totalorder %s1644_s16, %s2349_s1 }
  0x1c   : > { %p1647_p0 = pnand %p1974_p13, %p1645_p12 }
  0x1e   : > { %p1648_p3 = pneg %p1647_p0 }
  0x20   : > { %p1653_p7 = pnand %p1651_p5, %p1648_p3 }
  0x22   : > { %1656 = shalt.err (!%p1653_p7)
}
  0x23   : > { %s1657_s7 = scalar_lea.vmem %s1951_s8, 6144  ;;  %p1665_p1 = scmp.lt.s32.totalorder %s1951_s8, %s1951_s8 }
  0x24   : > { %p1658_p9 = scmp.ne.s32.totalorder %s1951_s8, %s1657_s7  ;;  %p1666_p4 = scmp.lt.s32.totalorder %s1657_s7, %s1657_s7 }
  0x26   : > { %p1660_p10 = pnand %p1658_p9, %p1974_p13  ;;  %p1667_p12 = por %p1666_p4, %p1665_p1 }
  0x28   : > { %p1661_p6 = pneg %p1660_p10 }
  0x2a   : > { %p1668_p0 = pnand %p1667_p12, %p1661_p6 }
  0x2c   : > { %1671 = shalt.err (!%p1668_p0)
}
  0x2d   : > { %s1853_s10 = smov 1024   ;;  %s1854_s12 = smov 64  }
  0x2e   : > { %1560 = dma.hbm_to_vmem [thread:$0]  (!%p1958_p11), %s2349_s1, 6144, %s1951_s8, [#allocation8], %s1853_s10, %s1853_s10, %s1854_s12  }
  0x2f   : > { %s1672_s18 = scalar_lea.hbm %s2350_s2, 256 }
  0x30   : > { %p1673_p1 = scmp.ne.s32.totalorder %s2350_s2, %s1672_s18  ;;  %p1679_p10 = scmp.lt.u32.totalorder %s1672_s18, %s2350_s2 }
  0x32   : > { %p1675_p4 = pnand %p1673_p1, %p1974_p13 }
  0x34   : > { %p1676_p6 = pneg %p1675_p4 }
  0x36   : > { %p1681_p3 = pnand %p1679_p10, %p1676_p6 }
  0x38   : > { %1684 = shalt.err (!%p1681_p3)
}
  0x39   : > { %s1685_s8 = scalar_lea.vmem %s1962_s11, 256  ;;  %p1693_p12 = scmp.lt.s32.totalorder %s1962_s11, %s1962_s11 }
  0x3a   : > { %p1686_p5 = scmp.ne.s32.totalorder %s1962_s11, %s1685_s8  ;;  %p1694_p0 = scmp.lt.s32.totalorder %s1685_s8, %s1685_s8 }
  0x3c   : > { %p1688_p7 = pnand %p1686_p5, %p1974_p13  ;;  %p1695_p1 = por %p1694_p0, %p1693_p12 }
  0x3e   : > { %p1689_p9 = pneg %p1688_p7 }
  0x40   : > { %p1696_p4 = pnand %p1695_p1, %p1689_p9 }
  0x42   : > { %1699 = shalt.err (!%p1696_p4)
}
  0x43   : > { %1563 = dma.hbm_to_vmem [thread:$0]  (!%p1958_p11), %s2350_s2, 256, %s1962_s11, [#allocation8]  }
  0x44   : > { %s1700_s16 = scalar_lea.hbm %s2351_s3, 256 }
  0x45   : > { %p1701_p6 = scmp.ne.s32.totalorder %s2351_s3, %s1700_s16  ;;  %p1707_p5 = scmp.lt.u32.totalorder %s1700_s16, %s2351_s3 }
  0x47   : > { %p1703_p10 = pnand %p1701_p6, %p1974_p13 }
  0x49   : > { %p1704_p3 = pneg %p1703_p10 }
  0x4b   : > { %p1709_p7 = pnand %p1707_p5, %p1704_p3 }
  0x4d   : > { %1712 = shalt.err (!%p1709_p7)
}
  0x4e   : > { %s1713_s7 = scalar_lea.vmem %s217_s13, 256  ;;  %p1721_p1 = scmp.lt.s32.totalorder %s217_s13, %s217_s13 }
  0x4f   : > { %p1714_p9 = scmp.ne.s32.totalorder %s217_s13, %s1713_s7  ;;  %p1722_p4 = scmp.lt.s32.totalorder %s1713_s7, %s1713_s7 }
  0x51   : > { %p1716_p12 = pnand %p1714_p9, %p1974_p13  ;;  %p1723_p8 = por %p1722_p4, %p1721_p1 }
  0x53   : > { %p1717_p0 = pneg %p1716_p12 }
  0x55   : > { %p1724_p2 = pnand %p1723_p8, %p1717_p0 }
  0x57   : > { %1727 = shalt.err (!%p1724_p2)
}
  0x58   : > { %1566 = dma.hbm_to_vmem [thread:$0]  (!%p1958_p11), %s2351_s3, 256, %s217_s13, [#allocation11]  }
  0x59   : > { %s45_s19 = sadd.s32 1, %s1836_s22  ;;  %s36_s30 = sadd.s32 1, %s1844_s24 }
  0x5a   : > { %p52_p2 = scmp.ne.s32.totalorder %s1836_s22, %s1832_s21  ;;  %p38_p8 = scmp.ge.s32.totalorder %s36_s30, 2 }
  0x5b   : > { %p53_p13 = scmp.eq.s32.totalorder %s1848_s25, 0  ;;  %p2367_p6 = scmp.ne.s32.totalorder %s2360_s28, 0 }
  0x5c   : > { %p1578_p3 = scmp.lt.s32.totalorder %s1848_s25, 2  ;;  %s2382_s30 = smov (%p38_p8, %s36_s30), 0 }
  0x5d   : > { %p2045_p10 = por %p2367_p6, %p52_p2  ;;  %p54_p5 = por %p53_p13, %p52_p2 }
  0x5e   : > { %s230_s10 = sand.u32 1, %s1836_s22   ;;  %s40_s14 = ssub.s32 %s1844_s24, %s2382_s30 }
  0x5f   : > { %p43_p7 = scmp.eq.s32.totalorder %s40_s14, 0  ;;  %s1471_s13 = sshll.u32 %s230_s10, 3 }
  0x60   : > { %s1540_s15 = sshll.u32 %s1844_s24, 7  ;;  %s234_s4 = scalar_lea.vmem [#allocation4], %s1471_s13 }
  0x61   : > { %s2057_s16 = scalar_select %p43_p7, %s1836_s22, %s45_s19  }
  0x62   : > { %s2062_s28 = scalar_lea.hbm %s2348_s0, %s1540_s15  ;;  %s243_s26 = sshll.u32 %s234_s4, 4  ;;  %s2064_s26 = int_to_ptr.vmem [resolvable:$true] %s243_s26 }
  0x63   : > { %p2068_p11 = pnand %p1578_p3, %p54_p5  ;;  %s2072_s11 = scalar_lea.sflag [#allocation5], %s230_s10 }
  0x64   : > { %s1728_s8 = scalar_lea.hbm %s2062_s28, 128  ;;  %s1733_s13 = scalar_lea.hbm %s2348_s0, 256 }
  0x65   : > { %p1729_p9 = scmp.ne.s32.totalorder %s2062_s28, %s1728_s8  ;;  %p1730_p12 = pneg %p2068_p11 }
  0x66   : > { %p1734_p4 = scmp.lt.u32.totalorder %s2062_s28, %s2348_s0  ;;  %p1735_p2 = scmp.lt.u32.totalorder %s1733_s13, %s1728_s8 }
  0x67   : > { %p1731_p0 = pnand %p1730_p12, %p1729_p9  ;;  %p1737_p13 = scmp.lt.u32.totalorder %s1728_s8, %s2062_s28 }
  0x68   : > { %p1736_p8 = por %p1735_p2, %p1734_p4 }
  0x69   : > { %p1732_p1 = pneg %p1731_p0 }
  0x6a   : > { %p1738_p6 = por %p1737_p13, %p1736_p8 }
  0x6c   : > { %p1739_p3 = pnand %p1738_p6, %p1732_p1 }
  0x6e   : > { %1742 = shalt.err (!%p1739_p3)
}
  0x6f   : > { %s1743_s10 = scalar_lea.vmem %s2064_s26, 128  ;;  %s1855_s18 = smov [#allocation4]  }
  0x70   : > { %p1744_p5 = scmp.ne.s32.totalorder %s2064_s26, %s1743_s10  ;;  %s1748_s4 = sshll.u32 %s1855_s18, 4  ;;  %s1749_s4 = int_to_ptr.vmem [resolvable:$false] %s1748_s4 }
  0x71   : > { %s1750_s19 = scalar_lea.vmem %s1749_s4, 256  ;;  %p1751_p0 = scmp.lt.s32.totalorder %s2064_s26, %s1749_s4 }
  0x72   : > { %p1746_p7 = pnand %p1744_p5, %p1730_p12  ;;  %p1752_p4 = scmp.lt.s32.totalorder %s1750_s19, %s1743_s10 }
  0x74   : > { %p1747_p9 = pneg %p1746_p7  ;;  %p1753_p2 = por %p1752_p4, %p1751_p0 }
  0x76   : > { %p1754_p8 = pnand %p1753_p2, %p1747_p9 }
  0x78   : > { %1757 = shalt.err (!%p1754_p8)
}
  0x79   : > { %s1856_s8 = smov 4   ;;  %p2370_p12 = scmp.ne.s32.totalorder %s2364_s6, 0 }
  0x7a   : > { %1570 = dma.hbm_to_vmem [thread:$0]  (!%p2068_p11), %s2062_s28, 128, %s2064_s26, %s2072_s11, %s1854_s12, %s1854_s12, %s1856_s8  }
  0x7b   : > { %255 = sbr.rel (%p2370_p12) target bundleno = 634 (0x27a), region = 40  ;;  %s2105_s14 = sand.u32 (!%p2370_p12), 1, %s1832_s21  }
  0x7c   : > { %s1475_s13 = sshll.u32 (!%p2370_p12), %s2105_s14, 3  ;;  %s258_s15 = scalar_lea.sflag (!%p2370_p12), [#allocation5], %s2105_s14 }
  0x7d   : > { %s2109_s17 = scalar_lea.vmem (!%p2370_p12), [#allocation4], %s1475_s13  ;;  %p2371_p1 = scmp.ne.s32.totalorder (!%p2370_p12), %s2361_s29, 0 }
  0x82   : > { %1811 = dma.done.wait (%p2371_p1), %s258_s15, 128  }
  0x83   : > { %1813 = vsyncadd (%p2371_p1), %s258_s15, 4294967168  ;;  %p2372_p11 = scmp.ne.s32.totalorder %s2359_s27, 0 }
  0x85   : > { %1815 = dma.done.wait (%p2372_p11), [#allocation8], 6400  }
  0x86   : > { %1817 = vsyncadd (%p2372_p11), [#allocation8], 4294960896 }
  0x87   : > { %1819 = dma.done.wait (%p2372_p11), [#allocation11], 256  }
  0x88   : > { %1821 = vsyncadd (%p2372_p11), [#allocation11], 4294967040  ;;  %v1857_v0 = vmov 0   ;;  %v308_v1 = vld [vmem:[#allocation7] sm:$0xff]  ;;  %v309_v3 = vld [vmem:[#allocation7 + $0x8] sm:$0xff]  ;;  %vm407_vm0 = vcmask 392192  }
  0x89   : > { %443 = vmatprep.mubr.bf16.mxu0 %v1857_v0  ;;  %486 = vmatprep.mubr.bf16.mxu1 %v1857_v0  ;;  %v310_v2 = vld [vmem:[#allocation7 + $0x40] sm:$0xff]  ;;  %v311_v5 = vld [vmem:[#allocation7 + $0x48] sm:$0xff]  ;;  %v569_v23 = vld [vmem:[#allocation7 + $0x10] sm:$0xff]  ;;  %s1333_s27 = sld [smem:[#allocation3]]  ;;  %s1537_s29 = sshll.u32 %s1840_s23, 4 }
  0x8a   : > { %v1481_v4 = vcombine.high %v308_v1, %v310_v2  ;;  %v1480_v6 = vcombine.low %v308_v1, %v310_v2  ;;  %v312_v7 = vld [vmem:[#allocation7 + $0x80] sm:$0xff]  ;;  %v1483_v9 = vcombine.high %v309_v3, %v311_v5  ;;  %v1482_v10 = vcombine.low %v309_v3, %v311_v5  ;;  %v313_v12 = vld [vmem:[#allocation7 + $0x88] sm:$0xff]  ;;  %v571_v24 = vld [vmem:[#allocation7 + $0x50] sm:$0xff]  ;;  %s298_s6 = scalar_lea.vmem [#allocation12], %s2105_s14  ;;  %s2299_s7 = scalar_lea.hbm %s2353_s5, %s1537_s29 }
  0x8b   : > { %v314_v8 = vld [vmem:[#allocation7 + $0xc0] sm:$0xff]  ;;  %v315_v13 = vld [vmem:[#allocation7 + $0xc8] sm:$0xff]  ;;  %v570_v25 = vld [vmem:[#allocation7 + $0x18] sm:$0xff]  ;;  %v1495_v29 = vcombine.high %v569_v23, %v571_v24  ;;  %v1494_v36 = vcombine.low %v569_v23, %v571_v24  ;;  %s1358_s12 = sshll.u32 %s298_s6, 4  ;;  %s1346_s11 = scalar_lea.sflag [#allocation6], %s2105_s14  ;;  %s2301_s12 = int_to_ptr.vmem [resolvable:$true] %s1358_s12 }
  0x8c   : > { %v1485_v11 = vcombine.high %v312_v7, %v314_v8  ;;  %v316_v14 = vld [vmem:[#allocation7 + $0x100] sm:$0xff]  ;;  %411 = vmatprep.subr.bf16.mxu0 %v1481_v4  ;;  %v1487_v15 = vcombine.high %v313_v12, %v315_v13  ;;  %v317_v17 = vld [vmem:[#allocation7 + $0x108] sm:$0xff]  ;;  %454 = vmatprep.subr.bf16.mxu1 %v1483_v9  ;;  %v1484_v19 = vcombine.low %v312_v7, %v314_v8  ;;  %v572_v26 = vld [vmem:[#allocation7 + $0x58] sm:$0xff]  ;;  %s1758_s10 = scalar_lea.vmem %s2301_s12, 16  ;;  %s1859_s23 = smov [#allocation12]  }
  0x8d   : > { %v318_v16 = vld [vmem:[#allocation7 + $0x140] sm:$0xff]  ;;  %v319_v18 = vld [vmem:[#allocation7 + $0x148] sm:$0xff]  ;;  %412 = vmatpush1.bf16.msra.mxu0 %v1480_v6  ;;  %455 = vmatpush1.bf16.msra.mxu1 %v1482_v10  ;;  %v1486_v20 = vcombine.low %v313_v12, %v315_v13  ;;  %v1497_v30 = vcombine.high %v570_v25, %v572_v26  ;;  %v573_v31 = vld [vmem:[#allocation7 + $0x90] sm:$0xff]  ;;  %v1496_v37 = vcombine.low %v570_v25, %v572_v26  ;;  %p1759_p13 = scmp.ne.s32.totalorder %s2301_s12, %s1758_s10  ;;  %s1762_s18 = sshll.u32 %s1859_s23, 4  ;;  %s1763_s18 = int_to_ptr.vmem [resolvable:$false] %s1762_s18 }
  0x8e   : > { %413 = vmatprep.subr.bf16.mxu0 %v1485_v11  ;;  %v1489_v21 = vcombine.high %v316_v14, %v318_v16  ;;  %456 = vmatprep.subr.bf16.mxu1 %v1487_v15  ;;  %v1491_v22 = vcombine.high %v317_v17, %v319_v18  ;;  %v1488_v27 = vcombine.low %v316_v14, %v318_v16  ;;  %v575_v32 = vld [vmem:[#allocation7 + $0xd0] sm:$0xff]  ;;  %v574_v34 = vld [vmem:[#allocation7 + $0x98] sm:$0xff]  ;;  %v821_v48 = vld [vmem:[#allocation7 + $0x20] sm:$0xff]  ;;  %s1764_s4 = scalar_lea.vmem %s1763_s18, 32  ;;  %p1765_p5 = scmp.lt.s32.totalorder %s2301_s12, %s1763_s18 }
  0x8f   : > { %v1490_v28 = vcombine.low %v317_v17, %v319_v18  ;;  %v2126_v33 = vld [vmem:[%s2109_s17] sm:$0xff]   ;;  %v1499_v38 = vcombine.high %v573_v31, %v575_v32  ;;  %v1498_v44 = vcombine.low %v573_v31, %v575_v32  ;;  %v823_v49 = vld [vmem:[#allocation7 + $0x60] sm:$0xff]  ;;  %v822_v50 = vld [vmem:[#allocation7 + $0x28] sm:$0xff]  ;;  %p1760_p6 = pnand %p1759_p13, %p2045_p10  ;;  %p1766_p7 = scmp.lt.s32.totalorder %s1764_s4, %s1758_s10 }
  0x90   : > { %v576_v35 = vld [vmem:[#allocation7 + $0xd8] sm:$0xff]  ;;  %v577_v40 = vld [vmem:[#allocation7 + $0x110] sm:$0xff]  ;;  %v824_v51 = vld [vmem:[#allocation7 + $0x68] sm:$0xff]  ;;  %v1509_v54 = vcombine.high %v821_v48, %v823_v49  ;;  %v1508_v60 = vcombine.low %v821_v48, %v823_v49 }
  0x91   : > { %414 = vmatpush1.bf16.msra.mxu0 %v1484_v19  ;;  %457 = vmatpush1.bf16.msra.mxu1 %v1486_v20  ;;  %v1501_v39 = vcombine.high %v574_v34, %v576_v35  ;;  %v579_v41 = vld [vmem:[#allocation7 + $0x150] sm:$0xff]  ;;  %v578_v42 = vld [vmem:[#allocation7 + $0x118] sm:$0xff]  ;;  %v1500_v45 = vcombine.low %v574_v34, %v576_v35  ;;  %v1511_v55 = vcombine.high %v822_v50, %v824_v51  ;;  %v825_v56 = vld [vmem:[#allocation7 + $0xa0] sm:$0xff]  ;;  %p1761_p3 = pneg %p1760_p6  ;;  %p1767_p9 = por %p1766_p7, %p1765_p5 }
  0x92   : > { %415 = vmatprep.subr.bf16.mxu0 %v1489_v21  ;;  %458 = vmatprep.subr.bf16.mxu1 %v1491_v22  ;;  %v580_v43 = vld [vmem:[#allocation7 + $0x158] sm:$0xff]  ;;  %v1503_v46 = vcombine.high %v577_v40, %v579_v41  ;;  %v1502_v52 = vcombine.low %v577_v40, %v579_v41  ;;  %v827_v57 = vld [vmem:[#allocation7 + $0xe0] sm:$0xff]  ;;  %v826_v58 = vld [vmem:[#allocation7 + $0xa8] sm:$0xff]  ;;  %v1510_v61 = vcombine.low %v822_v50, %v824_v51 }
  0x93   : > { %v1505_v47 = vcombine.high %v578_v42, %v580_v43  ;;  %v1504_v53 = vcombine.low %v578_v42, %v580_v43  ;;  %v828_v59 = vld [vmem:[#allocation7 + $0xe8] sm:$0xff]  ;;  %v1513_v62 = vcombine.high %v825_v56, %v827_v57  ;;  %v829_v1 = vld [vmem:[#allocation7 + $0x120] sm:$0xff]  ;;  %v1512_v5 = vcombine.low %v825_v56, %v827_v57  ;;  %v1073_v9 = vld [vmem:[#allocation7 + $0x30] sm:$0xff]  ;;  %p1768_p0 = pnand %p1767_p9, %p1761_p3 }
  0x94   : > { %v1515_v63 = vcombine.high %v826_v58, %v828_v59  ;;  %v831_v2 = vld [vmem:[#allocation7 + $0x160] sm:$0xff]  ;;  %v830_v3 = vld [vmem:[#allocation7 + $0x128] sm:$0xff]  ;;  %v1514_v6 = vcombine.low %v826_v58, %v828_v59  ;;  %v1075_v10 = vld [vmem:[#allocation7 + $0x70] sm:$0xff] }
  0x95   : > { %416 = vmatpush1.bf16.msra.mxu0 %v1488_v27  ;;  %459 = vmatpush1.bf16.msra.mxu1 %v1490_v28  ;;  %v832_v4 = vld [vmem:[#allocation7 + $0x168] sm:$0xff]  ;;  %v1517_v7 = vcombine.high %v829_v1, %v831_v2  ;;  %v1074_v11 = vld [vmem:[#allocation7 + $0x38] sm:$0xff]  ;;  %v1516_v13 = vcombine.low %v829_v1, %v831_v2  ;;  %v1523_v15 = vcombine.high %v1073_v9, %v1075_v10  ;;  %v1077_v17 = vld [vmem:[#allocation7 + $0xb0] sm:$0xff] }
  0x96   : > { %663 = vmatprep.subr.bf16.mxu0 %v1495_v29  ;;  %706 = vmatprep.subr.bf16.mxu1 %v1497_v30  ;;  %v1519_v8 = vcombine.high %v830_v3, %v832_v4  ;;  %v1076_v12 = vld [vmem:[#allocation7 + $0x78] sm:$0xff]  ;;  %v1518_v14 = vcombine.low %v830_v3, %v832_v4  ;;  %v1079_v18 = vld [vmem:[#allocation7 + $0xf0] sm:$0xff]  ;;  %v1522_v21 = vcombine.low %v1073_v9, %v1075_v10  ;;  %v581_v43 = vld [vmem:[#allocation9 + $0x4] sm:$0xf] }
  0x97   : > { %v1525_v16 = vcombine.high %v1074_v11, %v1076_v12  ;;  %v1078_v19 = vld [vmem:[#allocation7 + $0xb8] sm:$0xff]  ;;  %v1524_v22 = vcombine.low %v1074_v11, %v1076_v12  ;;  %v1527_v23 = vcombine.high %v1077_v17, %v1079_v18  ;;  %v1081_v25 = vld [vmem:[#allocation7 + $0x130] sm:$0xff]  ;;  %v1526_v29 = vcombine.low %v1077_v17, %v1079_v18  ;;  %v833_v50 = vld [vmem:[#allocation9 + $0x8] sm:$0xf] }
  0x98   : > { %1492 = vmatmul.mubr.msk.bf16.vlgmr.msra.gmra.mrb[0].mxu0 %vm407_vm0, %v2126_v33  ;;  %1493 = vmatmul.mubr.msk.bf16.vlgmr.msra.gmra.mrb[0].mxu1 %vm407_vm0, %v2126_v33  ;;  %v1080_v20 = vld [vmem:[#allocation7 + $0xf8] sm:$0xff]  ;;  %v1083_v26 = vld [vmem:[#allocation7 + $0x170] sm:$0xff] }
  0x99   : > { %664 = vmatpush1.bf16.msra.mxu0 %v1494_v36  ;;  %707 = vmatpush1.bf16.msra.mxu1 %v1496_v37  ;;  %v1529_v24 = vcombine.high %v1078_v19, %v1080_v20  ;;  %v1082_v27 = vld [vmem:[#allocation7 + $0x138] sm:$0xff]  ;;  %v1528_v30 = vcombine.low %v1078_v19, %v1080_v20  ;;  %v1531_v31 = vcombine.high %v1081_v25, %v1083_v26  ;;  %v322_v36 = vlaneseq  ;;  %v505_v42 = vld [vmem:[#allocation10] sm:$0xf] }
  0x9a   : > { %665 = vmatprep.subr.bf16.mxu0 %v1499_v38  ;;  %708 = vmatprep.subr.bf16.mxu1 %v1501_v39  ;;  %v1084_v28 = vld [vmem:[#allocation7 + $0x178] sm:$0xff]  ;;  %v1530_v34 = vcombine.low %v1081_v25, %v1083_v26 }
  0x9b   : > { %695 = vmatprep.mubr.bf16.mxu0 %v1857_v0  ;;  %738 = vmatprep.mubr.bf16.mxu1 %v1857_v0  ;;  %v1533_v32 = vcombine.high %v1082_v27, %v1084_v28  ;;  %v1532_v35 = vcombine.low %v1082_v27, %v1084_v28  ;;  %v323_v37 = vshrl.u32 %v322_v36, 7 }
  0x9d   : > { %666 = vmatpush1.bf16.msra.mxu0 %v1498_v44  ;;  %709 = vmatpush1.bf16.msra.mxu1 %v1500_v45  ;;  %v2150_v38 = vsub.s32 0, %v323_v37  ;;  %v2152_v39 = vsub.s32 1, %v323_v37  ;;  %v2154_v40 = vsub.s32 2, %v323_v37  ;;  %v2156_v41 = vsub.s32 3, %v323_v37 }
  0x9e   : > { %667 = vmatprep.subr.bf16.mxu0 %v1503_v46  ;;  %710 = vmatprep.subr.bf16.mxu1 %v1505_v47  ;;  %v757_v46 = vld [vmem:[#allocation10 + $0x4] sm:$0xf] }
  0x9f   : > { %v518_v48 = vrot.slane %v505_v42, %v2154_v40  ;;  %v514_v51 = vrot.slane %v505_v42, %v2152_v39  ;;  %v2173_v56 = vrot.slane %v757_v46, %v2150_v38  ;;  %v2176_v57 = vrot.slane %v581_v43, %v2154_v40 }
  0xa0   : > { %v2179_v58 = vrot.slane %v757_v46, %v2154_v40  ;;  %v2182_v59 = vrot.slane %v581_v43, %v2156_v41  ;;  %v2188_v1 = vrot.slane %v757_v46, %v2156_v41  ;;  %v2191_v2 = vrot.slane %v833_v50, %v2150_v38 }
  0xa1   : > { %668 = vmatpush1.bf16.msra.mxu0 %v1502_v52  ;;  %711 = vmatpush1.bf16.msra.mxu1 %v1504_v53  ;;  %v522_v52 = vrot.slane %v505_v42, %v2156_v41  ;;  %v2167_v53 = vrot.slane %v581_v43, %v2150_v38 }
  0xa2   : > { %915 = vmatprep.subr.bf16.mxu0 %v1509_v54  ;;  %958 = vmatprep.subr.bf16.mxu1 %v1511_v55  ;;  %v2170_v54 = vrot.slane %v581_v43, %v2152_v39 }
  0xa4   : > { %1506 = vmatmul.mubr.msk.bf16.vlgmr.msra.gmra.mrb[4].mxu0 %vm407_vm0, %v2126_v33  ;;  %1507 = vmatmul.mubr.msk.bf16.vlgmr.msra.gmra.mrb[4].mxu1 %vm407_vm0, %v2126_v33 }
  0xa5   : > { %916 = vmatpush1.bf16.msra.mxu0 %v1508_v60  ;;  %959 = vmatpush1.bf16.msra.mxu1 %v1510_v61 }
  0xa6   : > { %917 = vmatprep.subr.bf16.mxu0 %v1513_v62  ;;  %960 = vmatprep.subr.bf16.mxu1 %v1515_v63  ;;  %v2185_v63 = vrot.slane %v757_v46, %v2152_v39 }
  0xa7   : > { %947 = vmatprep.mubr.bf16.mxu0 %v1857_v0  ;;  %990 = vmatprep.mubr.bf16.mxu1 %v1857_v0 }
  0xa9   : > { %918 = vmatpush1.bf16.msra.mxu0 %v1512_v5  ;;  %961 = vmatpush1.bf16.msra.mxu1 %v1514_v6 }
  0xaa   : > { %919 = vmatprep.subr.bf16.mxu0 %v1517_v7  ;;  %962 = vmatprep.subr.bf16.mxu1 %v1519_v8  ;;  %v2194_v7 = vrot.slane %v833_v50, %v2154_v40  ;;  %v2197_v8 = vrot.slane %v833_v50, %v2152_v39 }
  0xad   : > { %920 = vmatpush1.bf16.msra.mxu0 %v1516_v13  ;;  %963 = vmatpush1.bf16.msra.mxu1 %v1518_v14  ;;  %v1009_v14 = vld [vmem:[#allocation10 + $0x8] sm:$0xf] }
  0xae   : > { %1167 = vmatprep.subr.bf16.mxu0 %v1523_v15  ;;  %1210 = vmatprep.subr.bf16.mxu1 %v1525_v16  ;;  %v2200_v15 = vrot.slane %v833_v50, %v2156_v41  ;;  %v2203_v28 = vrot.slane %v1009_v14, %v2150_v38 }
  0xb0   : > { %1520 = vmatmul.mubr.msk.bf16.vlgmr.msra.gmra.mrb[8].mxu0 %vm407_vm0, %v2126_v33  ;;  %1521 = vmatmul.mubr.msk.bf16.vlgmr.msra.gmra.mrb[8].mxu1 %vm407_vm0, %v2126_v33 }
  0xb1   : > { %1168 = vmatpush1.bf16.msra.mxu0 %v1522_v21  ;;  %1211 = vmatpush1.bf16.msra.mxu1 %v1524_v22 }
  0xb2   : > { %1169 = vmatprep.subr.bf16.mxu0 %v1527_v23  ;;  %1212 = vmatprep.subr.bf16.mxu1 %v1529_v24 }
  0xb3   : > { %1199 = vmatprep.mubr.bf16.mxu0 %v1857_v0  ;;  %1242 = vmatprep.mubr.bf16.mxu1 %v1857_v0  ;;  %v320_v0 = vld [vmem:[#allocation9] sm:$0xf] }
  0xb4   : > { %v325_v44 = vrot.slane %v320_v0, %v2150_v38  ;;  %v329_v45 = vrot.slane %v320_v0, %v2152_v39  ;;  %v333_v47 = vrot.slane %v320_v0, %v2154_v40  ;;  %v337_v49 = vrot.slane %v320_v0, %v2156_v41 }
  0xb5   : > { %1170 = vmatpush1.bf16.msra.mxu0 %v1526_v29  ;;  %1213 = vmatpush1.bf16.msra.mxu1 %v1528_v30  ;;  %v1085_v29 = vld [vmem:[#allocation9 + $0xc] sm:$0xf] }
  0xb6   : > { %1171 = vmatprep.subr.bf16.mxu0 %v1531_v31  ;;  %1214 = vmatprep.subr.bf16.mxu1 %v1533_v32  ;;  %v2215_v46 = vrot.slane %v1085_v29, %v2150_v38  ;;  %v2221_v50 = vrot.slane %v1085_v29, %v2154_v40 }
  0xb9   : > { %1172 = vmatpush1.bf16.msra.mxu0 %v1530_v34  ;;  %1215 = vmatpush1.bf16.msra.mxu1 %v1532_v35  ;;  %v2206_v34 = vrot.slane %v1009_v14, %v2152_v39  ;;  %v1261_v35 = vld [vmem:[#allocation10 + $0xc] sm:$0xf] }
  0xbc   : > { %1534 = vmatmul.mubr.msk.bf16.vlgmr.msra.gmra.mrb[12].mxu0 %vm407_vm0, %v2126_v33  ;;  %1535 = vmatmul.mubr.msk.bf16.vlgmr.msra.gmra.mrb[12].mxu1 %vm407_vm0, %v2126_v33  ;;  %v510_v33 = vrot.slane %v505_v42, %v2150_v38  ;;  %v2209_v42 = vrot.slane %v1009_v14, %v2154_v40 }
 0x16b   : > { %v445_v55 = vpop.f32.mrb[0].mxu0  ;;  %v488_v61 = vpop.f32.mrb[0].mxu1 }
 0x16c   : > { %v446_v60 = vadd.f32 %v445_v55, %v325_v44  ;;  %v447_v62 = vpop.f32.mrb[1].mxu0  ;;  %v489_v3 = vadd.f32 %v488_v61, %v333_v47  ;;  %v490_v5 = vpop.f32.mrb[1].mxu1  ;;  %v2224_v55 = vrot.slane %v1261_v35, %v2154_v40  ;;  %v2237_v40 = vrot.slane %v1261_v35, %v2156_v41 }
 0x16d   : > { %v448_v4 = vadd.f32 %v447_v62, %v329_v45  ;;  %v449_v6 = vpop.f32.mrb[2].mxu0  ;;  %v491_v10 = vadd.f32 %v490_v5, %v337_v49  ;;  %v492_v12 = vpop.f32.mrb[2].mxu1 }
 0x16e   : > { %v497_v9 = vmax.f32 %v446_v60, 0.0  ;;  %v450_v11 = vadd.f32 %v449_v6, %v325_v44  ;;  %v451_v13 = vpop.f32.mrb[3].mxu0  ;;  %v499_v16 = vmax.f32 %v489_v3, 0.0  ;;  %v493_v18 = vadd.f32 %v492_v12, %v333_v47  ;;  %v494_v20 = vpop.f32.mrb[3].mxu1 }
 0x16f   : > { %v498_v17 = vmax.f32 %v448_v4, 0.0  ;;  %v452_v19 = vadd.f32 %v451_v13, %v329_v45  ;;  %v500_v22 = vmax.f32 %v491_v10, 0.0  ;;  %v495_v24 = vadd.f32 %v494_v20, %v337_v49 }
 0x170   : > { %v527_v21 = vmul.f32 %v510_v33, %v497_v9  ;;  %v501_v23 = vmax.f32 %v450_v11, 0.0  ;;  %v529_v25 = vmul.f32 %v518_v48, %v499_v16  ;;  %v503_v26 = vmax.f32 %v493_v18, 0.0 }
 0x171   : > { %v502_v27 = vmax.f32 %v452_v19, 0.0  ;;  %v530_v30 = vmul.f32 %v522_v52, %v500_v22  ;;  %v504_v32 = vmax.f32 %v495_v24, 0.0  ;;  %v528_v36 = vmul.f32 %v514_v51, %v498_v17 }
 0x172   : > { %v531_v31 = vmul.f32 %v510_v33, %v501_v23  ;;  %v533_v37 = vmul.f32 %v518_v48, %v503_v26  ;;  %v2212_v45 = vrot.slane %v1009_v14, %v2156_v41  ;;  %v2218_v49 = vrot.slane %v1261_v35, %v2150_v38 }
 0x173   : > { %v532_v0 = vmul.f32 %v514_v51, %v502_v27  ;;  %v534_v44 = vmul.f32 %v522_v52, %v504_v32  ;;  %v2227_v52 = vrot.slane %v1085_v29, %v2152_v39  ;;  %v2230_v3 = vrot.slane %v1261_v35, %v2152_v39 }
 0x174   : > { %v535_v43 = vadd.f32 %v531_v31, %v527_v21  ;;  %v549_v33 = vadd.f32 %v533_v37, %v529_v25  ;;  %v2233_v38 = vrot.slane %v1085_v29, %v2156_v41 }
 0x175   : > { %v542_v47 = vadd.f32 %v532_v0, %v528_v36  ;;  %v556_v51 = vadd.f32 %v534_v44, %v530_v30 }
 0x176   : > { %v536_v48 = vrot.slane %v535_v43, 4  ;;  %v550_v60 = vrot.slane %v549_v33, 4 }
 0x177   : > { %v543_v61 = vrot.slane %v542_v47, 4  ;;  %v697_v62 = vpop.f32.mrb[4].mxu0  ;;  %v557_v5 = vrot.slane %v556_v51, 4  ;;  %v740_v9 = vpop.f32.mrb[4].mxu1 }
 0x178   : > { %v537_v4 = vadd.f32 %v536_v48, %v535_v43  ;;  %v698_v6 = vadd.f32 %v697_v62, %v2167_v53  ;;  %v699_v10 = vpop.f32.mrb[5].mxu0  ;;  %v551_v11 = vadd.f32 %v550_v60, %v549_v33  ;;  %v741_v13 = vadd.f32 %v740_v9, %v2176_v57  ;;  %v742_v39 = vpop.f32.mrb[5].mxu1 }
 0x179   : > { %v544_v12 = vadd.f32 %v543_v61, %v542_v47  ;;  %v700_v14 = vadd.f32 %v699_v10, %v2170_v54  ;;  %v701_v16 = vpop.f32.mrb[6].mxu0  ;;  %v743_v19 = vadd.f32 %v742_v39, %v2182_v59  ;;  %v744_v21 = vpop.f32.mrb[6].mxu1  ;;  %v558_v62 = vadd.f32 %v557_v5, %v556_v51 }
 0x17a   : > { %v538_v17 = vrot.slane %v537_v4, 2  ;;  %v749_v18 = vmax.f32 %v698_v6, 0.0  ;;  %v702_v20 = vadd.f32 %v701_v16, %v2167_v53  ;;  %v703_v22 = vpop.f32.mrb[7].mxu0  ;;  %v751_v24 = vmax.f32 %v741_v13, 0.0  ;;  %v746_v26 = vpop.f32.mrb[7].mxu1 }
 0x17b   : > { %v545_v23 = vrot.slane %v544_v12, 2  ;;  %v750_v41 = vmax.f32 %v700_v14, 0.0  ;;  %v745_v25 = vadd.f32 %v744_v21, %v2176_v57  ;;  %v752_v29 = vmax.f32 %v743_v19, 0.0 }
 0x17c   : > { %v779_v27 = vmul.f32 %v2173_v56, %v749_v18  ;;  %v753_v30 = vmax.f32 %v702_v20, 0.0  ;;  %v704_v31 = vadd.f32 %v703_v22, %v2170_v54  ;;  %v781_v32 = vmul.f32 %v2179_v58, %v751_v24 }
 0x17d   : > { %v780_v35 = vmul.f32 %v2185_v63, %v750_v41  ;;  %v755_v36 = vmax.f32 %v745_v25, 0.0  ;;  %v747_v53 = vadd.f32 %v746_v26, %v2182_v59  ;;  %v782_v37 = vmul.f32 %v2188_v1, %v752_v29 }
 0x17e   : > { %v783_v0 = vmul.f32 %v2173_v56, %v753_v30  ;;  %v754_v43 = vmax.f32 %v704_v31, 0.0  ;;  %v539_v57 = vadd.f32 %v538_v17, %v537_v4  ;;  %v546_v47 = vadd.f32 %v545_v23, %v544_v12 }
 0x17f   : > { %v785_v44 = vmul.f32 %v2179_v58, %v755_v36  ;;  %v756_v33 = vmax.f32 %v747_v53, 0.0  ;;  %v552_v48 = vrot.slane %v551_v11, 2  ;;  %v559_v39 = vrot.slane %v558_v62, 2 }
 0x180   : > { %v787_v60 = vadd.f32 %v783_v0, %v779_v27  ;;  %v784_v54 = vmul.f32 %v2185_v63, %v754_v43  ;;  %v540_v61 = vrot.slane %v539_v57, 1  ;;  %v547_v59 = vrot.slane %v546_v47, 1 }
 0x181   : > { %v801_v6 = vadd.f32 %v785_v44, %v781_v32  ;;  %v786_v9 = vmul.f32 %v2188_v1, %v756_v33  ;;  %v553_v10 = vadd.f32 %v552_v48, %v551_v11  ;;  %v560_v5 = vadd.f32 %v559_v39, %v558_v62 }
 0x182   : > { %v788_v13 = vrot.slane %v787_v60, 4  ;;  %v794_v14 = vadd.f32 %v784_v54, %v780_v35  ;;  %v541_v56 = vadd.f32 %v540_v61, %v539_v57  ;;  %v548_v17 = vadd.f32 %v547_v59, %v546_v47 }
 0x183   : > { %v802_v4 = vrot.slane %v801_v6, 4  ;;  %v808_v16 = vadd.f32 %v786_v9, %v782_v37  ;;  %v949_v58 = vpop.f32.mrb[8].mxu0  ;;  %v554_v12 = vrot.slane %v553_v10, 1  ;;  %v992_v20 = vpop.f32.mrb[8].mxu1 }
 0x184   : > { %v789_v18 = vadd.f32 %v788_v13, %v787_v60  ;;  %v795_v19 = vrot.slane %v794_v14, 4  ;;  %v950_v63 = vadd.f32 %v949_v58, %v2191_v2  ;;  %v951_v51 = vpop.f32.mrb[9].mxu0  ;;  %v993_v11 = vadd.f32 %v992_v20, %v2194_v7  ;;  %v994_v23 = vpop.f32.mrb[9].mxu1 }
 0x185   : > { %v803_v21 = vadd.f32 %v802_v4, %v801_v6  ;;  %v809_v1 = vrot.slane %v808_v16, 4  ;;  %v952_v22 = vadd.f32 %v951_v51, %v2197_v8  ;;  %v953_v24 = vpop.f32.mrb[10].mxu0  ;;  %v995_v27 = vadd.f32 %v994_v23, %v2200_v15  ;;  %v996_v29 = vpop.f32.mrb[10].mxu1 }
 0x186   : > { %v790_v41 = vrot.slane %v789_v18, 2  ;;  %v796_v25 = vadd.f32 %v795_v19, %v794_v14  ;;  %v1001_v26 = vmax.f32 %v950_v63, 0.0  ;;  %v955_v30 = vpop.f32.mrb[11].mxu0  ;;  %v1003_v35 = vmax.f32 %v993_v11, 0.0  ;;  %v998_v53 = vpop.f32.mrb[11].mxu1 }
 0x187   : > { %v804_v31 = vrot.slane %v803_v21, 2  ;;  %v2258_v32 = vadd.f32 %v809_v1, %v808_v16  ;;  %v1002_v36 = vmax.f32 %v952_v22, 0.0  ;;  %v1004_v57 = vmax.f32 %v995_v27, 0.0 }
 0x188   : > { %v791_v37 = vadd.f32 %v790_v41, %v789_v18  ;;  %v797_v0 = vrot.slane %v796_v25, 2  ;;  %v1031_v43 = vmul.f32 %v2203_v28, %v1001_v26  ;;  %v1033_v44 = vmul.f32 %v2209_v42, %v1003_v35 }
 0x189   : > { %v1032_v33 = vmul.f32 %v2206_v34, %v1002_v36  ;;  %v954_v47 = vadd.f32 %v953_v24, %v2191_v2  ;;  %v997_v48 = vadd.f32 %v996_v29, %v2194_v7  ;;  %v1034_v54 = vmul.f32 %v2212_v45, %v1004_v57 }
 0x18a   : > { %v798_v60 = vadd.f32 %v797_v0, %v796_v25  ;;  %v956_v61 = vadd.f32 %v955_v30, %v2197_v8  ;;  %v999_v62 = vadd.f32 %v998_v53, %v2200_v15  ;;  %v555_v59 = vadd.f32 %v554_v12, %v553_v10 }
 0x18b   : > { %v1005_v6 = vmax.f32 %v954_v47, 0.0  ;;  %v1007_v9 = vmax.f32 %v997_v48, 0.0  ;;  %v561_v13 = vrot.slane %v560_v5, 1  ;;  %v563_v4 = vadd.f32 %v548_v17, %v541_v56 }
 0x18c   : > { %v1006_v14 = vmax.f32 %v956_v61, 0.0  ;;  %v1008_v39 = vmax.f32 %v999_v62, 0.0  ;;  %v792_v16 = vrot.slane %v791_v37, 1  ;;  %v799_v18 = vrot.slane %v798_v60, 1 }
 0x18d   : > { %v1035_v58 = vmul.f32 %v2203_v28, %v1005_v6  ;;  %v1037_v2 = vmul.f32 %v2209_v42, %v1007_v9  ;;  %v562_v7 = vadd.f32 %v561_v13, %v560_v5  ;;  %v564_v63 = vadd.f32 %v563_v4, %v555_v59 }
 0x18e   : > { %v1036_v19 = vmul.f32 %v2206_v34, %v1006_v14  ;;  %v1038_v8 = vmul.f32 %v2212_v45, %v1008_v39  ;;  %v793_v15 = vadd.f32 %v792_v16, %v791_v37  ;;  %v800_v12 = vadd.f32 %v799_v18, %v798_v60 }
 0x18f   : > { %v1039_v20 = vadd.f32 %v1035_v58, %v1031_v43  ;;  %v1053_v51 = vadd.f32 %v1037_v2, %v1033_v44  ;;  %v1201_v10 = vpop.f32.mrb[12].mxu0  ;;  %v805_v1 = vadd.f32 %v804_v31, %v803_v21  ;;  %v565_v17 = vadd.f32 %v564_v63, %v562_v7  ;;  %v1244_v42 = vpop.f32.mrb[12].mxu1 }
 0x190   : > { %v1046_v11 = vadd.f32 %v1036_v19, %v1032_v33  ;;  %v2272_v56 = vadd.f32 %v1038_v8, %v1034_v54  ;;  %v1202_v28 = vadd.f32 %v1201_v10, %v2215_v46  ;;  %v1203_v5 = vpop.f32.mrb[13].mxu0  ;;  %v1245_v34 = vadd.f32 %v1244_v42, %v2221_v50  ;;  %v1246_v24 = vpop.f32.mrb[13].mxu1 }
 0x191   : > { %v1040_v22 = vrot.slane %v1039_v20, 4  ;;  %v1054_v23 = vrot.slane %v1053_v51, 4  ;;  %v1204_v45 = vadd.f32 %v1203_v5, %v2227_v52  ;;  %v1205_v41 = vpop.f32.mrb[14].mxu0  ;;  %566 = vadd.xlane.f32.xlu0 %v565_v17  ;;  %v1247_v27 = vadd.f32 %v1246_v24, %v2233_v38  ;;  %v1248_v29 = vpop.f32.mrb[14].mxu1 }
 0x192   : > { %v1047_v25 = vrot.slane %v1046_v11, 4  ;;  %v1061_v26 = vrot.slane %v2272_v56, 4  ;;  %v1253_v21 = vmax.f32 %v1202_v28, 0.0  ;;  %v1207_v30 = vpop.f32.mrb[15].mxu0  ;;  %v1255_v36 = vmax.f32 %v1245_v34, 0.0  ;;  %v1250_v37 = vpop.f32.mrb[15].mxu1 }
 0x193   : > { %v1041_v31 = vadd.f32 %v1040_v22, %v1039_v20  ;;  %v1055_v35 = vadd.f32 %v1054_v23, %v1053_v51  ;;  %v1254_v53 = vmax.f32 %v1204_v45, 0.0  ;;  %v1256_v57 = vmax.f32 %v1247_v27, 0.0 }
 0x194   : > { %v1048_v0 = vadd.f32 %v1047_v25, %v1046_v11  ;;  %v1283_v43 = vmul.f32 %v2218_v49, %v1253_v21  ;;  %v1206_v44 = vadd.f32 %v1205_v41, %v2215_v46  ;;  %v1285_v47 = vmul.f32 %v2224_v55, %v1255_v36 }
 0x195   : > { %v1042_v33 = vrot.slane %v1041_v31, 2  ;;  %v1284_v48 = vmul.f32 %v2230_v3, %v1254_v53  ;;  %v1249_v60 = vadd.f32 %v1248_v29, %v2221_v50  ;;  %v1286_v61 = vmul.f32 %v2237_v40, %v1256_v57 }
 0x196   : > { %v1049_v54 = vrot.slane %v1048_v0, 2  ;;  %v1257_v62 = vmax.f32 %v1206_v44, 0.0  ;;  %v1208_v6 = vadd.f32 %v1207_v30, %v2227_v52  ;;  %v1251_v59 = vadd.f32 %v1250_v37, %v2233_v38 }
 0x197   : > { %v1259_v9 = vmax.f32 %v1249_v60, 0.0  ;;  %v806_v13 = vrot.slane %v805_v1, 1  ;;  %v811_v14 = vrot.slane %v2258_v32, 2  ;;  %v815_v4 = vadd.f32 %v800_v12, %v793_v15 }
 0x198   : > { %v1287_v46 = vmul.f32 %v2218_v49, %v1257_v62  ;;  %v1258_v39 = vmax.f32 %v1208_v6, 0.0  ;;  %v1043_v16 = vadd.f32 %v1042_v33, %v1041_v31  ;;  %v1260_v50 = vmax.f32 %v1251_v59, 0.0 }
 0x199   : > { %v1289_v58 = vmul.f32 %v2224_v55, %v1259_v9  ;;  %v807_v2 = vadd.f32 %v806_v13, %v805_v1  ;;  %v812_v7 = vadd.f32 %v811_v14, %v2258_v32  ;;  %v1050_v8 = vadd.f32 %v1049_v54, %v1048_v0 }
 0x19a   : > { %v1291_v18 = vadd.f32 %v1287_v46, %v1283_v43  ;;  %v1288_v52 = vmul.f32 %v2230_v3, %v1258_v39  ;;  %v1044_v19 = vrot.slane %v1043_v16, 1  ;;  %v1290_v63 = vmul.f32 %v2237_v40, %v1260_v50 }
 0x19b   : > { %v1305_v38 = vadd.f32 %v1289_v58, %v1285_v47  ;;  %v813_v20 = vrot.slane %v812_v7, 1  ;;  %v816_v51 = vadd.f32 %v815_v4, %v807_v2  ;;  %v1051_v12 = vrot.slane %v1050_v8, 1 }
 0x19c   : > { %v1292_v49 = vrot.slane %v1291_v18, 4  ;;  %v1298_v10 = vadd.f32 %v1288_v52, %v1284_v48  ;;  %v1045_v15 = vadd.f32 %v1044_v19, %v1043_v16  ;;  %v1312_v55 = vadd.f32 %v1290_v63, %v1286_v61 }
 0x19d   : > { %v1306_v11 = vrot.slane %v1305_v38, 4  ;;  %v814_v17 = vadd.f32 %v813_v20, %v812_v7  ;;  %v1056_v1 = vrot.slane %v1055_v35, 2  ;;  %v1052_v42 = vadd.f32 %v1051_v12, %v1050_v8 }
 0x19e   : > { %v1293_v28 = vadd.f32 %v1292_v49, %v1291_v18  ;;  %v1299_v32 = vrot.slane %v1298_v10, 4  ;;  %v1062_v3 = vadd.f32 %v1061_v26, %v2272_v56  ;;  %v1313_v22 = vrot.slane %v1312_v55, 4 }
 0x19f   : > { %v1307_v5 = vadd.f32 %v1306_v11, %v1305_v38  ;;  %v817_v23 = vadd.f32 %v816_v51, %v814_v17  ;;  %v1057_v34 = vadd.f32 %v1056_v1, %v1055_v35  ;;  %v1067_v41 = vadd.f32 %v1052_v42, %v1045_v15 }
 0x1a0   : > { %v1294_v40 = vrot.slane %v1293_v28, 2  ;;  %v1300_v45 = vadd.f32 %v1299_v32, %v1298_v10  ;;  %v1063_v24 = vrot.slane %v1062_v3, 2  ;;  %v1314_v21 = vadd.f32 %v1313_v22, %v1312_v55 }
 0x1a1   : > { %v1308_v25 = vrot.slane %v1307_v5, 2  ;;  %818 = vadd.xlane.f32.xlu0 %v817_v23  ;;  %v1058_v27 = vrot.slane %v1057_v34, 1  ;;  %v1858_v13 = vmov 0.0   ;;  %v1334_v52 = vstv %s1333_s27 }
 0x1a2   : > { %v1295_v29 = vadd.f32 %v1294_v40, %v1293_v28  ;;  %v1301_v30 = vrot.slane %v1300_v45, 2  ;;  %v1064_v31 = vadd.f32 %v1063_v24, %v1062_v3  ;;  %v1315_v37 = vrot.slane %v1314_v21, 2  ;;  %305 = vst [vmem:[#allocation2] sm:$0x1] %v1858_v13 }
 0x1a3   : > { %v1059_v36 = vadd.f32 %v1058_v27, %v1057_v34  ;;  %v1309_v53 = vadd.f32 %v1308_v25, %v1307_v5 }
 0x1a4   : > { %v1302_v0 = vadd.f32 %v1301_v30, %v1300_v45  ;;  %v1065_v56 = vrot.slane %v1064_v31, 1  ;;  %v1296_v26 = vrot.slane %v1295_v29, 1  ;;  %v1316_v57 = vadd.f32 %v1315_v37, %v1314_v21 }
 0x1a5   : > { %v1068_v43 = vadd.f32 %v1067_v41, %v1059_v36  ;;  %v1310_v47 = vrot.slane %v1309_v53, 1 }
 0x1a6   : > { %v1066_v35 = vadd.f32 %v1065_v56, %v1064_v31  ;;  %v1297_v44 = vadd.f32 %v1296_v26, %v1295_v29  ;;  %v1303_v33 = vrot.slane %v1302_v0, 1  ;;  %v1317_v54 = vrot.slane %v1316_v57, 1 }
 0x1a7   : > { %v1311_v61 = vadd.f32 %v1310_v47, %v1309_v53 }
 0x1a8   : > { %v1069_v48 = vadd.f32 %v1068_v43, %v1066_v35  ;;  %v1304_v60 = vadd.f32 %v1303_v33, %v1302_v0  ;;  %v1318_v6 = vadd.f32 %v1317_v54, %v1316_v57 }
 0x1a9   : > { %v1325_v50 = vld [vmem:[#allocation2] sm:$0x1] }
 0x1aa   : > { %1070 = vadd.xlane.f32.xlu1 %v1069_v48  ;;  %v1319_v62 = vadd.f32 %v1304_v60, %v1297_v44 }
 0x1ac   : > { %v1320_v9 = vadd.f32 %v1319_v62, %v1311_v61 }
 0x1ae   : > { %v1321_v59 = vadd.f32 %v1320_v9, %v1318_v6 }
 0x1b0   : > { %1322 = vadd.xlane.f32.xlu1 %v1321_v59 }
 0x21e   : > { %v567_v14 = vpop.xlane.xlu0 %566 }
 0x22e   : > { %v819_v46 = vpop.xlane.xlu0 %818 }
 0x22f   : > { %v820_v4 = vadd.f32 %v819_v46, %v567_v14 }
 0x237   : > { %v1071_v39 = vpop.xlane.xlu1 %1070 }
 0x238   : > { %v1072_v16 = vadd.f32 %v1071_v39, %v820_v4 }
 0x23d   : > { %v1323_v58 = vpop.xlane.xlu1 %1322 }
 0x23e   : > { %v1324_v2 = vadd.f32 %v1323_v58, %v1072_v16 }
 0x240   : > { %v1326_v7 = vadd.f32 %v1325_v50, %v1324_v2 }
 0x242   : > { %1327 = vst [vmem:[#allocation2] sm:$0x1] %v1326_v7 }
 0x249   : > { %v1331_v18 = vld [vmem:[#allocation2] sm:$0x1] }
 0x24a   : > { %v1332_v19 = vmul.f32 0.0625, %v1331_v18 }
 0x24c   : > { %v1335_v8 = vadd.f32 %v1334_v52, %v1332_v19 }
 0x24e   : > { %v1536_v38 = vclamps-f32 %v1335_v8, 30.0 }
 0x250   : > { %v1338_v63 = vsub.f32 0.0, %v1536_v38 }
 0x252   : > { %v1339_v20 = vmul.f32 1.442695, %v1338_v63 }
 0x254   : > { %1640 = vpow2.f32 %v1339_v20 }
 0x25e   : > { %v1641_v51 = vpop.eup %1640 }
 0x25f   : > { %v1341_v49 = vadd.f32 1.0, %v1641_v51 }
 0x261   : > { %1642 = vrcp.f32 %v1341_v49 }
 0x26b   : > { %v1643_v10 = vpop.eup %1642 }
 0x26c   : > { %1344 = vst [vmem:[%s298_s6] sm:$0x1] %v1643_v10 }
 0x26d   : > { %1771 = shalt.err (!%p1768_p0)
}
 0x26e   : > { %s1772_s19 = scalar_lea.hbm %s2299_s7, 16  ;;  %s1776_s13 = scalar_lea.hbm %s2353_s5, 32 }
 0x26f   : > { %p1773_p4 = scmp.ne.s32.totalorder %s2299_s7, %s1772_s19  ;;  %p1777_p12 = scmp.lt.u32.totalorder %s2299_s7, %s2353_s5 }
 0x270   : > { %p1778_p1 = scmp.lt.u32.totalorder %s1776_s13, %s1772_s19  ;;  %p1780_p13 = scmp.lt.u32.totalorder %s1772_s19, %s2299_s7 }
 0x271   : > { %p1774_p2 = pnand %p1773_p4, %p2045_p10 }
 0x272   : > { %p1779_p11 = por %p1778_p1, %p1777_p12 }
 0x273   : > { %p1775_p8 = pneg %p1774_p2 }
 0x274   : > { %p1781_p6 = por %p1780_p13, %p1779_p11 }
 0x276   : > { %p1782_p3 = pnand %p1781_p6, %p1775_p8 }
 0x278   : > { %1785 = shalt.err (!%p1782_p3)
}
 0x279   : > { %1555 = dma.vmem_to_hbm [thread:$0]  (%p2045_p10), %s2301_s12, 16, %s2299_s7, %s1346_s11  }
 0x27a PF: > { %s2373_s27 = sld [smem:[#allocation17_spill]]  ;;  %s1370_s29 = sand.u32 1, %s1828_s20  }
 0x27b   : > { %p2375_p7 = scmp.ge.s32.totalorder %s1848_s25, 2  ;;  %s1371_s6 = scalar_lea.sflag [#allocation6], %s1370_s29 }
 0x280   : > { %p2374_p5 = scmp.ne.s32.totalorder %s2373_s27, 0 }
 0x282   : > { %p1572_p9 = pnand %p2375_p7, %p2374_p5 }
 0x284   : > { %1823 = dma.done.wait (!%p1572_p9), %s1371_s6, 16  }
 0x285   : > { %1825 = vsyncadd (!%p1572_p9), %s1371_s6, 4294967280  ;;  %s24_s25 = sadd.s32 1, %s1848_s25   ;;  %s2376_s20 = smov %s1832_s21 }
 0x286   : > { %p21_p0 = scmp.ge.s32.totalorder %s24_s25, 4   ;;  %s2377_s21 = smov %s1836_s22 }
 0x287   : > { %s2378_s22 = smov %s2057_s16  ;;  %s2379_s23 = smov %s1844_s24 }
 0x288   : > { %s2380_s24 = smov %s2382_s30  ;;  %23 = sbr.rel (!%p21_p0) target bundleno = 10 (0xa), region = 105 }
 0x28f   :  { %1375 = vsyncpa [#allocation5], 1 }
 0x290   :  { %1377 = vsyncpa [#allocation5 + $0x1], 1 }
 0x291   :  { %1378 = vsyncpa [#allocation8], 1 }
 0x292   :  { %1379 = vsyncpa [#allocation11], 1 }
 0x293   :  { %1380 = vsyncpa [#allocation6], 1 }
 0x294   :  { %1382 = vsyncpa [#allocation6 + $0x1], 1 }

</bundles_post_ra>
